<compile_context>
chip_gen: v5e
topology: v5e:2x2
jax: 0.10.0
libtpu: 0.0.40
codegen_flags: <defaults>
</compile_context>

<pallas_src>
import jax
import jax.numpy as jnp
from jax.experimental import pallas as pl
from jax.experimental.pallas import tpu as pltpu


def _round_up(x, m):
    return ((x + m - 1) // m) * m


def _tpu_generation():
    """Best-effort TPU generation sniffing (None if unknown)."""
    try:
        kind = jax.devices()[0].device_kind.lower()
    except Exception:
        return None
    for g in (7, 6, 5, 4):
        if f"v{g}" in kind:
            return g
    return None


def _tile_defaults(gen):
    """(tm, tn, tk, vmem_cap_bytes) per TPU generation."""
    if gen == 7:   # v7x: 64 MiB VMEM / TensorCore, ~3.2 TB/s HBM
        return 512, 512, 1024, 48 << 20
    if gen == 6:   # v6e: 128 MiB VMEM, ~1.4 TB/s HBM -> larger tiles for f32
        return 512, 1024, 1024, 100 << 20
    if gen == 5:   # v5e/v5p: lower HBM BW, 1 vector-store slot
        return 256, 512, 1024, 100 << 20
    # Unknown generation: conservative config that fits v7x's 64 MiB VMEM.
    return 512, 512, 1024, 48 << 20


def _pick_tm(m, pref):
    """Pick an 8-aligned M tile <= pref that avoids massive over-padding."""
    m_al = _round_up(max(m, 1), 8)
    pref = max(8, (min(pref, m_al) // 8) * 8)
    best, best_pad = pref, _round_up(m_al, pref)
    c = pref
    while c > 64:
        c = max(64, ((c // 2) // 8) * 8)
        pad = _round_up(m_al, c)
        if pad < best_pad:
            best, best_pad = c, pad
        if c == 64:
            break
    return best


def _linear_kernel(x_ref, w_ref, o_ref):
    # Grid: (M//tm, N//tn, K//tk); K is the reduction axis (last, "arbitrary").
    # x_ref: (tm, tk), w_ref: (tk, tn) -> MXU-native layout, no in-kernel
    # transpose. The output block index is constant over k, so o_ref stays
    # VMEM-resident for the whole reduction: accumulate into it directly (f32).
    prod = jnp.dot(x_ref[...], w_ref[...], preferred_element_type=jnp.float32)
    k = pl.program_id(2)

    @pl.when(k == 0)
    def _():
        o_ref[...] = prod          # first step: write, no zero-init round trip

    @pl.when(k != 0)
    def _():
        o_ref[...] += prod


def _matmul_padded(x2, wt, *, M, K, N, tm, tn, tk, Kp, Np, vmem_cap):
    """x2: (M, K) f32, wt: (Kp, Np) f32 (pre-transposed, pre-padded weight)."""
    Mp = _round_up(max(M, 1), tm)
    if (Mp, Kp) != (M, K):
        # Zero-padding K contributes zeros to the accumulation -> unchanged.
        x2 = jnp.pad(x2, ((0, Mp - M), (0, Kp - K)))

    grid = (Mp // tm, Np // tn, Kp // tk)
    itemsize = 4  # f32 everywhere

    # Double-buffered X / W^T / output tiles + compiler-internal headroom,
    # clamped to a generation-safe cap.
    footprint = (2 * tm * tk + 2 * tk * tn + 2 * tm * tn) * itemsize + (2 << 20)
    vmem_bytes = int(min(max(footprint, 32 << 20), vmem_cap))

    cost = pl.CostEstimate(
        flops=2 * Mp * Np * Kp,
        transcendentals=0,
        # True streamed traffic: X is re-read per j-block, W^T per i-block.
        bytes_accessed=int(
            (grid[1] * Mp * Kp + grid[0] * Kp * Np + Mp * Np) * itemsize
        ),
    )

    yp = pl.pallas_call(
        _linear_kernel,
        out_shape=jax.ShapeDtypeStruct((Mp, Np), jnp.float32),
        grid_spec=pltpu.PrefetchScalarGridSpec(
            num_scalar_prefetch=0,
            grid=grid,
            in_specs=[
                pl.BlockSpec((tm, tk), lambda i, j, k: (i, k)),  # X tile
                pl.BlockSpec((tk, tn), lambda i, j, k: (k, j)),  # W^T tile
            ],
            out_specs=pl.BlockSpec((tm, tn), lambda i, j, k: (i, j)),
        ),
        compiler_params=pltpu.CompilerParams(
            dimension_semantics=("parallel", "parallel", "arbitrary"),
            vmem_limit_bytes=vmem_bytes,
        ),
        cost_estimate=cost,
    )(x2, wt)

    if (Mp, Np) != (M, N):
        yp = yp[:M, :N]
    return yp


class MatmulBasePallas:
    """Pallas TPU equivalent of MatmulBase (nn.Linear, bias=False, float32).

    The PyTorch-layout weight (out_features, in_features) is transposed and
    zero-padded ONCE at construction, so the per-call hot path only tiles X.
    """

    def __init__(self, weight, *, tm=None, tn=None, tk=None):
        gen = _tpu_generation()
        d_tm, d_tn, d_tk, cap = _tile_defaults(gen)
        self._gen = gen
        self._pref_tm = tm or d_tm
        self._vmem_cap = cap

        w = jnp.asarray(weight, jnp.float32)
        N, K = w.shape
        tn_ = min(tn or d_tn, _round_up(N, 128))
        tk_ = min(tk or d_tk, _round_up(K, 128))
        Np = _round_up(N, tn_)
        Kp = _round_up(K, tk_)
        wt = w.T  # one-time transpose: RHS fed to the MXU as [K, N]
        if (Kp, Np) != (K, N):
            wt = jnp.pad(wt, ((0, Kp - K), (0, Np - N)))

        self._wt = wt
        self._N, self._K = N, K
        self._tn, self._tk = tn_, tk_
        self._Kp, self._Np = Kp, Np

    def __call__(self, x):
        orig_shape = x.shape
        K = orig_shape[-1]
        assert K == self._K, "in_features mismatch between x and weight"

        x2 = jnp.asarray(x, jnp.float32).reshape(-1, K)
        M = x2.shape[0]
        tm = _pick_tm(M, self._pref_tm)
        tn = self._tn
        Mp = _round_up(max(M, 1), tm)

        # v7x has 2 TensorCores: make sure at least one parallel axis exposes
        # >= 2 blocks for small-M layers (tn stays a divisor of the padded Np).
        if (self._gen == 7 and Mp // tm == 1 and self._Np // tn == 1
                and tn >= 256):
            tn //= 2

        y = _matmul_padded(
            x2, self._wt, M=M, K=K, N=self._N,
            tm=tm, tn=tn, tk=self._tk, Kp=self._Kp, Np=self._Np,
            vmem_cap=self._vmem_cap,
        )
        return y.reshape(*orig_shape[:-1], self._N)


def matmul_base_forward(x, w, **tile_kwargs):
    """Convenience one-shot call (prefer MatmulBasePallas for repeated calls,
    so the weight transpose/pad is hoisted out of the hot path)."""
    return MatmulBasePallas(w, **tile_kwargs)(x)


if __name__ == "__main__":
    # Small shapes consistent with MatmulBase(in_features, out_features).
    batch = 8
    in_features = 32
    out_features = 32

    key = jax.random.PRNGKey(0)
    kx, kw = jax.random.split(key)
    x = jax.random.normal(kx, (batch, in_features), dtype=jnp.float32)
    # Deterministic init mimicking nn.Linear's kaiming-uniform scale.
    bound = 1.0 / jnp.sqrt(in_features)
    w = jax.random.uniform(
        kw, (out_features, in_features), dtype=jnp.float32,
        minval=-bound, maxval=bound,
    )

    module = MatmulBasePallas(w)   # weight transposed/padded once, here
    y = module(x)
    jax.block_until_ready(y)

    # Correctness check against plain JAX reference (same semantics as torch).
    y_ref = x @ w.T
    assert y.shape == (batch, out_features)
    assert jnp.allclose(y, y_ref, atol=1e-5, rtol=1e-5)

    print("KERNEL_OK")
</pallas_src>

<mosaic_0001>
module attributes {stable_mosaic.version = 11 : i64} {
  func.func @_linear_kernel(%arg0: i32, %arg1: i32, %arg2: i32, %arg3: memref<8x128xf32, #tpu.memory_space<vmem>>, %arg4: memref<128x128xf32, #tpu.memory_space<vmem>>, %arg5: memref<8x128xf32, #tpu.memory_space<vmem>>) attributes {dimension_semantics = [#tpu.dimension_semantics<parallel>, #tpu.dimension_semantics<parallel>, #tpu.dimension_semantics<arbitrary>], iteration_bounds = array<i64: 1, 1, 1>, scalar_prefetch = 0 : i64, scratch_operands = 0 : i64, tpu.core_type = #tpu.core_type<tc>, window_params = [{transform_indices = @transform_0, window_bounds = array<i64: 8, 128>}, {transform_indices = @transform_1, window_bounds = array<i64: 128, 128>}, {transform_indices = @transform_2, window_bounds = array<i64: 8, 128>}]} {
    %c0 = arith.constant 0 : index
    %c0_0 = arith.constant 0 : index
    %0 = vector.load %arg3[%c0, %c0_0] : memref<8x128xf32, #tpu.memory_space<vmem>>, vector<8x128xf32>
    %c0_1 = arith.constant 0 : index
    %c0_2 = arith.constant 0 : index
    %1 = vector.load %arg4[%c0_1, %c0_2] : memref<128x128xf32, #tpu.memory_space<vmem>>, vector<128x128xf32>
    %cst = arith.constant dense<0.000000e+00> : vector<8x128xf32>
    %2 = tpu.matmul %0, %1, %cst {dimension_numbers = #tpu.dot_dimension_numbers<[1], [0], [0], [1], [0, 0, 1, 1], [], []>} : vector<8x128xf32>, vector<128x128xf32>, vector<8x128xf32> -> vector<8x128xf32>
    %c0_i32 = arith.constant 0 : i32
    %3 = arith.cmpi eq, %arg2, %c0_i32 : i32
    %4 = arith.extui %3 : i1 to i32
    %c0_i32_3 = arith.constant 0 : i32
    %5 = arith.cmpi ne, %4, %c0_i32_3 : i32
    scf.if %5 {
      %c0_6 = arith.constant 0 : index
      %c0_7 = arith.constant 0 : index
      %9 = vector.load %arg5[%c0_6, %c0_7] : memref<8x128xf32, #tpu.memory_space<vmem>>, vector<8x128xf32>
      tpu.vector_store %arg5[%c0_6, %c0_7], %2 {strides = array<i32>} : memref<8x128xf32, #tpu.memory_space<vmem>>, vector<8x128xf32>,
    } else {
    }
    %c0_i32_4 = arith.constant 0 : i32
    %6 = arith.cmpi ne, %arg2, %c0_i32_4 : i32
    %7 = arith.extui %6 : i1 to i32
    %c0_i32_5 = arith.constant 0 : i32
    %8 = arith.cmpi ne, %7, %c0_i32_5 : i32
    scf.if %8 {
      %c0_6 = arith.constant 0 : index
      %c0_7 = arith.constant 0 : index
      %9 = vector.load %arg5[%c0_6, %c0_7] : memref<8x128xf32, #tpu.memory_space<vmem>>, vector<8x128xf32>
      %10 = arith.addf %9, %2 : vector<8x128xf32>
      %c0_8 = arith.constant 0 : index
      %c0_9 = arith.constant 0 : index
      %11 = vector.load %arg5[%c0_8, %c0_9] : memref<8x128xf32, #tpu.memory_space<vmem>>, vector<8x128xf32>
      tpu.vector_store %arg5[%c0_8, %c0_9], %10 {strides = array<i32>} : memref<8x128xf32, #tpu.memory_space<vmem>>, vector<8x128xf32>,
    } else {
    }
    return
  }
  func.func @transform_0(%arg0: i32, %arg1: i32, %arg2: i32) -> (i32, i32) {
    %c0_i32 = arith.constant 0 : i32
    return %arg0, %arg2 : i32, i32
  }
  func.func @transform_1(%arg0: i32, %arg1: i32, %arg2: i32) -> (i32, i32) {
    %c0_i32 = arith.constant 0 : i32
    return %arg2, %arg1 : i32, i32
  }
  func.func @transform_2(%arg0: i32, %arg1: i32, %arg2: i32) -> (i32, i32) {
    %c0_i32 = arith.constant 0 : i32
    return %arg0, %arg1 : i32, i32
  }
}

</mosaic_0001>

<bundles_post_ra>
// kernel: tpu_custom_call.1
= control target key start
LH: loop header
LB: loop body
LE: loop exit
PB: predicated region body
PF: predicated region fallthrough
CT: control target
= control target key end

     0   :  { %7 = vsyncpa [#allocation3], 0  ;;  %s221_s0 = inlined_call_operand.hbm [shape: f32[8,128], index: 0, kind: input, shape index: {}]   ;;  %s222_s1 = inlined_call_operand.hbm [shape: f32[128,128], index: 1, kind: input, shape index: {}]   ;;  %s223_s2 = inlined_call_operand.hbm [shape: f32[8,128], index: 2, kind: output, shape index: {}]  }
   0x1   :  { %8 = vsyncpa [#allocation6], 0 }
   0x2   :  { %9 = vsyncpa [#allocation4], 0  ;;  %s15_s11 = sshll.u32 %s221_s0, 4  ;;  %s192_s12 = smov [#allocation2]   ;;  %s16_s11 = int_to_ptr.hbm [resolvable:$true] %s15_s11 }
   0x3   :  { %s17_s13 = sshll.u32 %s192_s12, 4  ;;  %s25_s16 = sshll.u32 %s222_s1, 4  ;;  %s18_s13 = int_to_ptr.vmem [resolvable:$true] %s17_s13  ;;  %s26_s16 = int_to_ptr.hbm [resolvable:$true] %s25_s16 }
   0x4   :  { %20 = dma.hbm_to_vmem [thread:$0]  %s16_s11, 128, %s18_s13, [#allocation3]  }
   0x5   :  { %s193_s17 = smov [#allocation5]   ;;  %s194_s19 = smov 128  }
   0x6   :  { %s27_s18 = sshll.u32 %s193_s17, 4  ;;  %s195_s20 = smov 8   ;;  %s28_s18 = int_to_ptr.vmem [resolvable:$true] %s27_s18 }
   0x7   :  { %33 = dma.hbm_to_vmem [thread:$0]  %s26_s16, 2048, %s28_s18, [#allocation6], %s194_s19, %s194_s19, %s195_s20  }
   0x8   :  { %186 = dma.done.wait [#allocation3], 128  }
   0x9   :  { %187 = vsyncadd [#allocation3], 4294967168 }
   0xa   :  { %188 = dma.done.wait [#allocation6], 2048  }
   0xb   :  { %189 = vsyncadd [#allocation6], 4294965248  ;;  %v58_v0 = vld [vmem:[#allocation5 + $0x78] sm:$0xff]  ;;  %v57_v1 = vld [vmem:[#allocation5 + $0x70] sm:$0xff]  ;;  %s196_s0 = smov [#allocation7]   ;;  %s98_s23 = sshll.u32 %s223_s2, 4  ;;  %s99_s23 = int_to_ptr.hbm [resolvable:$true] %s98_s23 }
   0xc   :  { %59 = vmatpush.msra.mxu0 %v58_v0  ;;  %v56_v2 = vld [vmem:[#allocation5 + $0x68] sm:$0xff]  ;;  %v55_v3 = vld [vmem:[#allocation5 + $0x60] sm:$0xff]  ;;  %v54_v4 = vld [vmem:[#allocation5 + $0x58] sm:$0xff]  ;;  %s96_s1 = sshll.u32 %s196_s0, 4  ;;  %s97_s1 = int_to_ptr.vmem [resolvable:$true] %s96_s1 }
   0xd   :  { %v53_v5 = vld [vmem:[#allocation5 + $0x50] sm:$0xff]  ;;  %v52_v6 = vld [vmem:[#allocation5 + $0x48] sm:$0xff]  ;;  %v51_v7 = vld [vmem:[#allocation5 + $0x40] sm:$0xff] }
   0xe   :  { %60 = vmatpush.msra.mxu0 %v57_v1  ;;  %v50_v8 = vld [vmem:[#allocation5 + $0x38] sm:$0xff]  ;;  %v49_v9 = vld [vmem:[#allocation5 + $0x30] sm:$0xff]  ;;  %v48_v10 = vld [vmem:[#allocation5 + $0x28] sm:$0xff] }
   0xf   :  { %v47_v11 = vld [vmem:[#allocation5 + $0x20] sm:$0xff]  ;;  %v46_v12 = vld [vmem:[#allocation5 + $0x18] sm:$0xff]  ;;  %v45_v13 = vld [vmem:[#allocation5 + $0x10] sm:$0xff] }
  0x10   :  { %61 = vmatpush.msra.mxu0 %v56_v2  ;;  %v44_v14 = vld [vmem:[#allocation5 + $0x8] sm:$0xff]  ;;  %v43_v15 = vld [vmem:[#allocation5] sm:$0xff]  ;;  %v42_v16 = vld [vmem:[#allocation2] sm:$0xff] }
  0x12   :  { %62 = vmatpush.msra.mxu0 %v55_v3 }
  0x14   :  { %63 = vmatpush.msra.mxu0 %v54_v4 }
  0x16   :  { %64 = vmatpush.msra.mxu0 %v53_v5 }
  0x18   :  { %65 = vmatpush.msra.mxu0 %v52_v6 }
  0x1a   :  { %66 = vmatpush.msra.mxu0 %v51_v7 }
  0x1c   :  { %67 = vmatpush.msra.mxu0 %v50_v8 }
  0x1e   :  { %68 = vmatpush.msra.mxu0 %v49_v9 }
  0x20   :  { %69 = vmatpush.msra.mxu0 %v48_v10 }
  0x22   :  { %70 = vmatpush.msra.mxu0 %v47_v11 }
  0x24   :  { %71 = vmatpush.msra.mxu0 %v46_v12 }
  0x26   :  { %72 = vmatpush.msra.mxu0 %v45_v13 }
  0x28   :  { %73 = vmatpush.msra.mxu0 %v44_v14 }
  0x2a   :  { %74 = vmatpush.msra.mxu0 %v43_v15 }
  0x2b   :  { %75 = vmatmul.f32.vlgmr.msra.gmra.mxu0 %v42_v16 }
  0xa8   :  { %v76_v17 = vpop.f32.mrf.mxu0 }
  0xa9   :  { %83 = vst [vmem:[#allocation7] sm:$0xff] %v76_v17 }
  0xaa   :  { %101 = dma.vmem_to_hbm [thread:$0]  %s97_s1, 128, %s99_s23, [#allocation4]  }
  0xab   :  { %190 = dma.done.wait [#allocation4], 128  }
  0xac   :  { %191 = vsyncadd [#allocation4], 4294967168 }
  0xad   :  { %106 = vsyncpa [#allocation3], 1 }
  0xae   :  { %107 = vsyncpa [#allocation6], 1 }
  0xaf   :  { %108 = vsyncpa [#allocation4], 1 }

</bundles_post_ra>
